<compile_context>
chip_gen: v7x
topology: tpu7x:2x2x1
jax: 0.10.0
libtpu: 0.0.40
codegen_flags: <defaults>
</compile_context>

<pallas_src>
import functools

import jax
import jax.numpy as jnp
from jax.experimental import pallas as pl
from jax.experimental.pallas import tpu as pltpu

DIM_INPUT = 16
DIM_INTER = 32
DIM_EMB = 2            # Circle/Disk2 both emit 2-d positions => dim_embedding == 2
MAX_VALUE = 0.9        # Disk2(max_value=0.9)
DEFAULT_TILE_N = 4096  # node columns (lanes) per grid step (review: 2048-8192)


def _round_up(v, m):
    return ((v + m - 1) // m) * m


def _round8(v):
    return _round_up(v, 8)


# Row offsets of each layer inside the packed weight/bias slabs (all multiples of 8).
R_E1 = 0
R_E2 = R_E1 + _round8(DIM_INTER)
R_P = R_E2 + _round8(DIM_INTER)
HEAD_ROWS = _round8(1 + DIM_EMB)              # fused pos_code1 (1 row) + pos_code2 (2 rows)
R_D1 = R_P + HEAD_ROWS
R_D2 = R_D1 + _round8(DIM_INTER)
R_D3 = R_D2 + _round8(DIM_INTER)
W_ROWS = R_D3 + _round8(DIM_INPUT)            # = 152 for the default dims
W_COLS = max(DIM_INPUT, DIM_INTER, DIM_EMB)   # widest fan-in (= 32)

# Row layout of the single merged output slab.
R_OUT2 = 0                                    # rows  0..15 : reconstruction (dim_input)
R_POS = R_OUT2 + DIM_INPUT                    # rows 16..17 : position (dim_emb)
OUT_ROWS = _round8(R_POS + DIM_EMB)           # rows 18..23 : zero padding -> 24 rows


def _hsdne_kernel(x_ref, hier_ref, w_ref, b_ref, out_ref, *, approx_recip):
    f32 = jnp.float32
    tn = x_ref.shape[0]                 # node columns in this tile
    hier = hier_ref[...]                # (1, tn) int32

    def dense(act, row, f_out, f_in, contract_minor=False):
        # hLinear in feature-major layout: tanh(W @ act + b), W is (f_out, f_in).
        # Operands are fed to the MXU in the I/O dtype (bf16 fast path); accumulation,
        # bias add and tanh stay f32 (v5e-safe; on v6e/v7x bf16 elementwise is an option).
        wl = w_ref[row:row + f_out, :f_in]
        bl = b_ref[row:row + f_out, :]
        a = act.astype(wl.dtype)        # cast only right before the dot
        if contract_minor:
            # act is NODE-MAJOR (tn, f_in): contract both minor dims (the q·kᵀ pattern),
            # avoiding any materialised transpose of the input tile.
            y = jax.lax.dot_general(wl, a, (((1,), (1,)), ((), ())),
                                    preferred_element_type=f32)
        else:
            y = jnp.dot(wl, a, preferred_element_type=f32)
        return jnp.tanh(y + bl)

    # ---------------- encoder ----------------
    h = dense(x_ref[...], R_E1, DIM_INTER, DIM_INPUT, contract_minor=True)   # (32, tn)
    h = dense(h, R_E2, DIM_INTER, DIM_INTER)

    # ---------------- fused position heads (one matmul for both) ----------------
    head = dense(h, R_P, HEAD_ROWS, DIM_INTER)     # (8, tn); rows >= 3 are zero padding
    p1 = head[0:1, :]                              # pos_code1 output (1, tn)
    p2 = head[1:3, :]                              # pos_code2 output (2, tn)

    # Circle(): 1-d code -> point on the unit circle.
    ang = jnp.pi * p1                                                   # (1, tn)
    row_idx = jax.lax.broadcasted_iota(jnp.int32, (DIM_EMB, tn), 0)
    cosv = jnp.broadcast_to(jnp.cos(ang), (DIM_EMB, tn))
    sinv = jnp.broadcast_to(jnp.sin(ang), (DIM_EMB, tn))
    circ = jnp.where(row_idx == 0, cosv, sinv)                          # (2, tn)

    # Disk2(max_value): 2-d code -> point strictly inside disk of radius max_value.
    nrm = jnp.sqrt(p2[0:1, :] * p2[0:1, :] + p2[1:2, :] * p2[1:2, :])   # (1, tn)
    if approx_recip:
        inv = pl.reciprocal(nrm + 1e-12, approx=True)   # EUP slot, off the VALU
    else:
        inv = 1.0 / (nrm + 1e-12)                       # exact parity path (io f32)
    disk = p2 * (MAX_VALUE * jnp.tanh(nrm) * inv)                       # (2, tn)

    # Row-wise select by hierarchy; nodes with other values stay 0 (matches the torch
    # zeros + boolean-mask assignment, since all heads are independent per node).
    hb = jnp.broadcast_to(hier, (DIM_EMB, tn))
    pos = jnp.where(hb == 0, circ, jnp.where(hb == 1, disk, jnp.zeros_like(circ)))

    # ---------------- decoder ----------------
    g = dense(pos, R_D1, DIM_INTER, DIM_EMB)
    g = dense(g, R_D2, DIM_INTER, DIM_INTER)
    out2 = dense(g, R_D3, DIM_INPUT, DIM_INTER)

    # Single merged, lane-dense output slab (rows 0..15 out2, 16..17 pos, 18..23 zeros).
    out_ref[R_OUT2:R_OUT2 + DIM_INPUT, :] = out2.astype(out_ref.dtype)
    out_ref[R_POS:R_POS + DIM_EMB, :] = pos.astype(out_ref.dtype)
    out_ref[R_POS + DIM_EMB:OUT_ROWS, :] = jnp.zeros(
        (OUT_ROWS - R_POS - DIM_EMB, tn), out_ref.dtype)


def init_params(key):
    """PyTorch-Linear-style init, stored node-major: W (fan_in, fan_out), b (1, fan_out)."""
    def linear(k, fan_in, fan_out):
        k1, k2 = jax.random.split(k)
        bound = float(fan_in) ** -0.5
        w = jax.random.uniform(k1, (fan_in, fan_out), jnp.float32, -bound, bound)
        b = jax.random.uniform(k2, (1, fan_out), jnp.float32, -bound, bound)
        return w, b
    ks = jax.random.split(key, 7)
    return (
        linear(ks[0], DIM_INPUT, DIM_INTER),   # encoder[0]
        linear(ks[1], DIM_INTER, DIM_INTER),   # encoder[1]
        linear(ks[2], DIM_INTER, 1),           # pos_code1
        linear(ks[3], DIM_INTER, 2),           # pos_code2
        linear(ks[4], DIM_EMB, DIM_INTER),     # decoder[0]
        linear(ks[5], DIM_INTER, DIM_INTER),   # decoder[1]
        linear(ks[6], DIM_INTER, DIM_INPUT),   # decoder[2]
    )


def pack_params(params, io_dtype):
    """Pack all layers into one (W_ROWS, W_COLS) weight slab and one (W_ROWS, 1) bias slab."""
    (we1, be1), (we2, be2), (wp1, bp1), (wp2, bp2), \
        (wd1, bd1), (wd2, bd2), (wd3, bd3) = params
    w = jnp.zeros((W_ROWS, W_COLS), jnp.float32)
    b = jnp.zeros((W_ROWS, 1), jnp.float32)

    def put(w, b, row, wi, bi):
        wt = wi.T                                        # feature-major: (fan_out, fan_in)
        w = w.at[row:row + wt.shape[0], :wt.shape[1]].set(wt)
        b = b.at[row:row + wt.shape[0], :].set(bi.T)
        return w, b

    w, b = put(w, b, R_E1, we1, be1)
    w, b = put(w, b, R_E2, we2, be2)
    w, b = put(w, b, R_P, wp1, bp1)          # fused heads: row R_P     -> pos_code1
    w, b = put(w, b, R_P + 1, wp2, bp2)      #              rows +1,+2  -> pos_code2
    w, b = put(w, b, R_D1, wd1, bd1)
    w, b = put(w, b, R_D2, wd2, bd2)
    w, b = put(w, b, R_D3, wd3, bd3)
    # Weights stored in io_dtype (bf16 -> native MXU operands); biases stay f32.
    return w.astype(io_dtype), b


def _choose_tile(n, tile_n):
    """Pick a lane-dense node tile (multiple of 128) and the padded node count."""
    n128 = _round_up(n, 128)
    tn = _round_up(max(128, min(tile_n, n128)), 128)
    # Keep >= 2 grid steps when the batch spans >= 2 lane-tiles, so v7x's two
    # TensorCores can split the ("parallel",) node axis.
    if n128 >= 2 * 128:
        tn = min(tn, _round_up(-(-n128 // 2), 128))
    n_pad = _round_up(n, tn)
    return tn, n_pad


@functools.partial(jax.jit, static_argnames=("io_dtype", "tile_n"))
def hsdne_forward(batch, attn, hierarchy, params, *,
                  io_dtype=jnp.bfloat16, tile_n=DEFAULT_TILE_N):
    # `attn` accepted for API parity with the torch module; hLinear's dense path does
    # not consume it.  # TODO(synk): exact attn usage inside gehm.hLinear unknown.
    del attn
    n = batch.shape[0]
    tn, n_pad = _choose_tile(n, tile_n)
    pad_n = n_pad - n

    # NODE-MAJOR input goes straight to the kernel (no host transpose / zeros+scatter);
    # at most a cheap zero-pad along the node axis when n is not a tile multiple.
    x_in = batch.astype(jnp.float32)
    if pad_n:
        x_in = jnp.pad(x_in, ((0, pad_n), (0, 0)))
    hier_in = jnp.pad(hierarchy.astype(jnp.int32).reshape(1, n),
                      ((0, 0), (0, pad_n)), constant_values=2)  # pad=2 -> position stays 0

    w_slab, b_slab = pack_params(params, io_dtype)

    kernel = functools.partial(_hsdne_kernel,
                               approx_recip=(io_dtype != jnp.float32))

    fn = pl.pallas_call(
        kernel,
        out_shape=jax.ShapeDtypeStruct((OUT_ROWS, n_pad), io_dtype),
        grid_spec=pltpu.PrefetchScalarGridSpec(
            num_scalar_prefetch=0,
            grid=(n_pad // tn,),
            in_specs=[
                pl.BlockSpec((tn, DIM_INPUT), lambda i: (i, 0)),    # node-major x tile
                pl.BlockSpec((1, tn), lambda i: (0, i)),            # hierarchy tile
                pl.BlockSpec((W_ROWS, W_COLS), lambda i: (0, 0)),   # resident weight slab
                pl.BlockSpec((W_ROWS, 1), lambda i: (0, 0)),        # resident bias slab
            ],
            out_specs=pl.BlockSpec((OUT_ROWS, tn), lambda i: (0, i)),  # merged lane-dense slab
        ),
        compiler_params=pltpu.CompilerParams(
            dimension_semantics=("parallel",),          # megacore split of the node axis
            vmem_limit_bytes=48 * 1024 * 1024),         # clears v5e's 16 MiB scoped default
    )
    slab = fn(x_in, hier_in, w_slab, b_slab)

    # Back to node-major f32 for API parity with the torch module.  A feature-major
    # consumer could skip these host-side slices/transposes entirely.
    pos = slab[R_POS:R_POS + DIM_EMB, :n].T.astype(jnp.float32)
    out2 = slab[R_OUT2:R_OUT2 + DIM_INPUT, :n].T.astype(jnp.float32)
    return pos, out2


def reference(batch, hierarchy, params):
    """Pure-JAX reference mirroring the torch forward (node-major)."""
    (we1, be1), (we2, be2), (wp1, bp1), (wp2, bp2), \
        (wd1, bd1), (wd2, bd2), (wd3, bd3) = params
    h = jnp.tanh(batch @ we1 + be1)
    h = jnp.tanh(h @ we2 + be2)
    p1 = jnp.tanh(h @ wp1 + bp1)
    p2 = jnp.tanh(h @ wp2 + bp2)
    circ = jnp.concatenate([jnp.cos(jnp.pi * p1), jnp.sin(jnp.pi * p1)], axis=-1)
    nrm = jnp.sqrt(jnp.sum(p2 * p2, axis=-1, keepdims=True))
    disk = p2 * (MAX_VALUE * jnp.tanh(nrm) / (nrm + 1e-12))
    hc = hierarchy.reshape(-1, 1)
    pos = jnp.where(hc == 0, circ, jnp.where(hc == 1, disk, 0.0))
    g = jnp.tanh(pos @ wd1 + bd1)
    g = jnp.tanh(g @ wd2 + bd2)
    out2 = jnp.tanh(g @ wd3 + bd3)
    return pos, out2


def _bf16_round(x):
    return x.astype(jnp.bfloat16).astype(jnp.float32)


if __name__ == "__main__":
    key = jax.random.PRNGKey(0)
    kx, kh, ka, kp = jax.random.split(key, 4)
    params = init_params(kp)
    # bf16-rounded weights (biases stay f32), mirroring what the bf16-I/O kernel sees.
    params_q = tuple((_bf16_round(w), b) for (w, b) in params)

    for n_nodes in (16, 1024):   # single-block case and a 2-step ("parallel") grid case
        kxn = jax.random.fold_in(kx, n_nodes)
        khn = jax.random.fold_in(kh, n_nodes)
        batch = jax.random.normal(kxn, (n_nodes, DIM_INPUT), jnp.float32)
        attn = jax.random.normal(ka, (n_nodes, n_nodes), jnp.float32)
        hierarchy = jax.random.bernoulli(khn, 0.5, (n_nodes,)).astype(jnp.int32)

        # --- f32 I/O path: parity check against the pure-JAX reference (exact divide) ---
        pos32, out32 = hsdne_forward(batch, attn, hierarchy, params, io_dtype=jnp.float32)
        jax.block_until_ready((pos32, out32))
        pos_r, out_r = reference(batch, hierarchy, params)
        assert jnp.allclose(pos32, pos_r, atol=2e-2), "f32 position mismatch"
        assert jnp.allclose(out32, out_r, atol=2e-2), "f32 reconstruction mismatch"

        # --- bf16 I/O path (default fast path): compare against a reference fed the same
        #     bf16-quantized inputs/weights (f32 accumulation in both) ---
        pos16, out16 = hsdne_forward(batch, attn, hierarchy, params, io_dtype=jnp.bfloat16)
        jax.block_until_ready((pos16, out16))
        pos_rq, out_rq = reference(_bf16_round(batch), hierarchy, params_q)
        assert jnp.allclose(pos16, pos_rq, atol=5e-2), "bf16 position mismatch"
        assert jnp.allclose(out16, out_rq, atol=5e-2), "bf16 reconstruction mismatch"

    print("KERNEL_OK")
</pallas_src>

<mosaic_0001>
module attributes {stable_mosaic.version = 11 : i64} {
  func.func @_hsdne_kernel(%arg0: i32, %arg1: memref<128x16xf32, #tpu.memory_space<vmem>>, %arg2: memref<1x128xi32, #tpu.memory_space<vmem>>, %arg3: memref<152x32xf32, #tpu.memory_space<vmem>>, %arg4: memref<152x1xf32, #tpu.memory_space<vmem>>, %arg5: memref<24x128xf32, #tpu.memory_space<vmem>>) attributes {dimension_semantics = [#tpu.dimension_semantics<parallel>], iteration_bounds = array<i64: 1>, scalar_prefetch = 0 : i64, scratch_operands = 0 : i64, tpu.core_type = #tpu.core_type<tc>, window_params = [{transform_indices = @transform_0, window_bounds = array<i64: 128, 16>}, {transform_indices = @transform_1, window_bounds = array<i64: 1, 128>}, {pipeline_mode = #tpu.pipeline_mode<synchronous>, transform_indices = @transform_2, window_bounds = array<i64: 152, 32>}, {pipeline_mode = #tpu.pipeline_mode<synchronous>, transform_indices = @transform_3, window_bounds = array<i64: 152, 1>}, {transform_indices = @transform_4, window_bounds = array<i64: 24, 128>}]} {
    %c0 = arith.constant 0 : index
    %c0_0 = arith.constant 0 : index
    %0 = vector.load %arg2[%c0, %c0_0] : memref<1x128xi32, #tpu.memory_space<vmem>>, vector<1x128xi32>
    %c0_1 = arith.constant 0 : index
    %c0_2 = arith.constant 0 : index
    %1 = vector.load %arg1[%c0_1, %c0_2] : memref<128x16xf32, #tpu.memory_space<vmem>>, vector<128x16xf32>
    %c0_3 = arith.constant 0 : index
    %c0_4 = arith.constant 0 : index
    %2 = vector.load %arg3[%c0_3, %c0_4] : memref<152x32xf32, #tpu.memory_space<vmem>>, vector<32x16xf32>
    %c0_5 = arith.constant 0 : index
    %c0_6 = arith.constant 0 : index
    %3 = vector.load %arg4[%c0_5, %c0_6] : memref<152x1xf32, #tpu.memory_space<vmem>>, vector<32x1xf32>
    %cst = arith.constant dense<0.000000e+00> : vector<32x128xf32>
    %4 = tpu.matmul %2, %1, %cst {dimension_numbers = #tpu.dot_dimension_numbers<[1], [1], [0], [0], [0, 0, 1, 0], [], []>} : vector<32x16xf32>, vector<128x16xf32>, vector<32x128xf32> -> vector<32x128xf32>
    %5 = vector.broadcast %3 : vector<32x1xf32> to vector<32x128xf32>
    %6 = arith.addf %4, %5 : vector<32x128xf32>
    %7 = math.tanh %6 : vector<32x128xf32>
    %c32 = arith.constant 32 : index
    %c0_7 = arith.constant 0 : index
    %8 = vector.load %arg3[%c32, %c0_7] : memref<152x32xf32, #tpu.memory_space<vmem>>, vector<32x32xf32>
    %c32_8 = arith.constant 32 : index
    %c0_9 = arith.constant 0 : index
    %9 = vector.load %arg4[%c32_8, %c0_9] : memref<152x1xf32, #tpu.memory_space<vmem>>, vector<32x1xf32>
    %cst_10 = arith.constant dense<0.000000e+00> : vector<32x128xf32>
    %10 = tpu.matmul %8, %7, %cst_10 {dimension_numbers = #tpu.dot_dimension_numbers<[1], [0], [0], [1], [0, 0, 1, 1], [], []>} : vector<32x32xf32>, vector<32x128xf32>, vector<32x128xf32> -> vector<32x128xf32>
    %11 = vector.broadcast %9 : vector<32x1xf32> to vector<32x128xf32>
    %12 = arith.addf %10, %11 : vector<32x128xf32>
    %13 = math.tanh %12 : vector<32x128xf32>
    %c64 = arith.constant 64 : index
    %c0_11 = arith.constant 0 : index
    %14 = vector.load %arg3[%c64, %c0_11] : memref<152x32xf32, #tpu.memory_space<vmem>>, vector<8x32xf32>
    %c64_12 = arith.constant 64 : index
    %c0_13 = arith.constant 0 : index
    %15 = vector.load %arg4[%c64_12, %c0_13] : memref<152x1xf32, #tpu.memory_space<vmem>>, vector<8x1xf32>
    %cst_14 = arith.constant dense<0.000000e+00> : vector<8x128xf32>
    %16 = tpu.matmul %14, %13, %cst_14 {dimension_numbers = #tpu.dot_dimension_numbers<[1], [0], [0], [1], [0, 0, 1, 1], [], []>} : vector<8x32xf32>, vector<32x128xf32>, vector<8x128xf32> -> vector<8x128xf32>
    %17 = vector.broadcast %15 : vector<8x1xf32> to vector<8x128xf32>
    %18 = arith.addf %16, %17 : vector<8x128xf32>
    %19 = math.tanh %18 : vector<8x128xf32>
    %20 = vector.extract_strided_slice %19 {offsets = [0, 0], sizes = [1, 128], strides = [1, 1]} : vector<8x128xf32> to vector<1x128xf32>
    %21 = vector.extract_strided_slice %19 {offsets = [1, 0], sizes = [2, 128], strides = [1, 1]} : vector<8x128xf32> to vector<2x128xf32>
    %cst_15 = arith.constant 3.14159274 : f32
    %22 = vector.broadcast %cst_15 : f32 to vector<1x128xf32>
    %23 = arith.mulf %22, %20 : vector<1x128xf32>
    %24 = tpu.iota {dimensions = array<i32: 0>} : vector<2x128xi32>
    %25 = math.cos %23 : vector<1x128xf32>
    %26 = vector.shape_cast %25 : vector<1x128xf32> to vector<1x128xf32>
    %27 = vector.broadcast %26 : vector<1x128xf32> to vector<2x128xf32>
    %28 = math.sin %23 : vector<1x128xf32>
    %29 = vector.shape_cast %28 : vector<1x128xf32> to vector<1x128xf32>
    %30 = vector.broadcast %29 : vector<1x128xf32> to vector<2x128xf32>
    %c0_i32 = arith.constant 0 : i32
    %31 = vector.broadcast %c0_i32 : i32 to vector<2x128xi32>
    %32 = arith.cmpi eq, %24, %31 : vector<2x128xi32>
    %33 = arith.select %32, %27, %30 : vector<2x128xi1>, vector<2x128xf32>
    %34 = vector.extract_strided_slice %21 {offsets = [0, 0], sizes = [1, 128], strides = [1, 1]} : vector<2x128xf32> to vector<1x128xf32>
    %35 = vector.extract_strided_slice %21 {offsets = [0, 0], sizes = [1, 128], strides = [1, 1]} : vector<2x128xf32> to vector<1x128xf32>
    %36 = arith.mulf %34, %35 : vector<1x128xf32>
    %37 = vector.extract_strided_slice %21 {offsets = [1, 0], sizes = [1, 128], strides = [1, 1]} : vector<2x128xf32> to vector<1x128xf32>
    %38 = vector.extract_strided_slice %21 {offsets = [1, 0], sizes = [1, 128], strides = [1, 1]} : vector<2x128xf32> to vector<1x128xf32>
    %39 = arith.mulf %37, %38 : vector<1x128xf32>
    %40 = arith.addf %36, %39 : vector<1x128xf32>
    %41 = math.sqrt %40 : vector<1x128xf32>
    %cst_16 = arith.constant 9.99999996E-13 : f32
    %42 = vector.broadcast %cst_16 : f32 to vector<1x128xf32>
    %43 = arith.addf %41, %42 : vector<1x128xf32>
    %cst_17 = arith.constant 1.000000e+00 : f32
    %44 = vector.broadcast %cst_17 : f32 to vector<1x128xf32>
    %45 = arith.divf %44, %43 : vector<1x128xf32>
    %46 = math.tanh %41 : vector<1x128xf32>
    %cst_18 = arith.constant 0.899999976 : f32
    %47 = vector.broadcast %cst_18 : f32 to vector<1x128xf32>
    %48 = arith.mulf %47, %46 : vector<1x128xf32>
    %49 = arith.mulf %48, %45 : vector<1x128xf32>
    %50 = vector.broadcast %49 : vector<1x128xf32> to vector<2x128xf32>
    %51 = arith.mulf %21, %50 : vector<2x128xf32>
    %52 = vector.shape_cast %0 : vector<1x128xi32> to vector<1x128xi32>
    %53 = vector.broadcast %52 : vector<1x128xi32> to vector<2x128xi32>
    %c0_i32_19 = arith.constant 0 : i32
    %54 = vector.broadcast %c0_i32_19 : i32 to vector<2x128xi32>
    %55 = arith.cmpi eq, %53, %54 : vector<2x128xi32>
    %c1_i32 = arith.constant 1 : i32
    %56 = vector.broadcast %c1_i32 : i32 to vector<2x128xi32>
    %57 = arith.cmpi eq, %53, %56 : vector<2x128xi32>
    %cst_20 = arith.constant 0.000000e+00 : f32
    %58 = vector.broadcast %cst_20 : f32 to vector<2x128xf32>
    %59 = arith.select %57, %51, %58 : vector<2x128xi1>, vector<2x128xf32>
    %60 = arith.select %55, %33, %59 : vector<2x128xi1>, vector<2x128xf32>
    %c72 = arith.constant 72 : index
    %c0_21 = arith.constant 0 : index
    %61 = vector.load %arg3[%c72, %c0_21] : memref<152x32xf32, #tpu.memory_space<vmem>>, vector<32x2xf32>
    %c72_22 = arith.constant 72 : index
    %c0_23 = arith.constant 0 : index
    %62 = vector.load %arg4[%c72_22, %c0_23] : memref<152x1xf32, #tpu.memory_space<vmem>>, vector<32x1xf32>
    %cst_24 = arith.constant dense<0.000000e+00> : vector<32x128xf32>
    %63 = tpu.matmul %61, %60, %cst_24 {dimension_numbers = #tpu.dot_dimension_numbers<[1], [0], [0], [1], [0, 0, 1, 1], [], []>} : vector<32x2xf32>, vector<2x128xf32>, vector<32x128xf32> -> vector<32x128xf32>
    %64 = vector.broadcast %62 : vector<32x1xf32> to vector<32x128xf32>
    %65 = arith.addf %63, %64 : vector<32x128xf32>
    %66 = math.tanh %65 : vector<32x128xf32>
    %c104 = arith.constant 104 : index
    %c0_25 = arith.constant 0 : index
    %67 = vector.load %arg3[%c104, %c0_25] : memref<152x32xf32, #tpu.memory_space<vmem>>, vector<32x32xf32>
    %c104_26 = arith.constant 104 : index
    %c0_27 = arith.constant 0 : index
    %68 = vector.load %arg4[%c104_26, %c0_27] : memref<152x1xf32, #tpu.memory_space<vmem>>, vector<32x1xf32>
    %cst_28 = arith.constant dense<0.000000e+00> : vector<32x128xf32>
    %69 = tpu.matmul %67, %66, %cst_28 {dimension_numbers = #tpu.dot_dimension_numbers<[1], [0], [0], [1], [0, 0, 1, 1], [], []>} : vector<32x32xf32>, vector<32x128xf32>, vector<32x128xf32> -> vector<32x128xf32>
    %70 = vector.broadcast %68 : vector<32x1xf32> to vector<32x128xf32>
    %71 = arith.addf %69, %70 : vector<32x128xf32>
    %72 = math.tanh %71 : vector<32x128xf32>
    %c136 = arith.constant 136 : index
    %c0_29 = arith.constant 0 : index
    %73 = vector.load %arg3[%c136, %c0_29] : memref<152x32xf32, #tpu.memory_space<vmem>>, vector<16x32xf32>
    %c136_30 = arith.constant 136 : index
    %c0_31 = arith.constant 0 : index
    %74 = vector.load %arg4[%c136_30, %c0_31] : memref<152x1xf32, #tpu.memory_space<vmem>>, vector<16x1xf32>
    %cst_32 = arith.constant dense<0.000000e+00> : vector<16x128xf32>
    %75 = tpu.matmul %73, %72, %cst_32 {dimension_numbers = #tpu.dot_dimension_numbers<[1], [0], [0], [1], [0, 0, 1, 1], [], []>} : vector<16x32xf32>, vector<32x128xf32>, vector<16x128xf32> -> vector<16x128xf32>
    %76 = vector.broadcast %74 : vector<16x1xf32> to vector<16x128xf32>
    %77 = arith.addf %75, %76 : vector<16x128xf32>
    %78 = math.tanh %77 : vector<16x128xf32>
    %c0_33 = arith.constant 0 : index
    %c0_34 = arith.constant 0 : index
    %79 = vector.load %arg5[%c0_33, %c0_34] : memref<24x128xf32, #tpu.memory_space<vmem>>, vector<16x128xf32>
    tpu.vector_store %arg5[%c0_33, %c0_34], %78 {strides = array<i32>} : memref<24x128xf32, #tpu.memory_space<vmem>>, vector<16x128xf32>,
    %c16 = arith.constant 16 : index
    %c0_35 = arith.constant 0 : index
    %80 = vector.load %arg5[%c16, %c0_35] : memref<24x128xf32, #tpu.memory_space<vmem>>, vector<2x128xf32>
    tpu.vector_store %arg5[%c16, %c0_35], %60 {strides = array<i32>} : memref<24x128xf32, #tpu.memory_space<vmem>>, vector<2x128xf32>,
    %cst_36 = arith.constant 0.000000e+00 : f32
    %81 = vector.broadcast %cst_36 : f32 to vector<6x128xf32>
    %c18 = arith.constant 18 : index
    %c0_37 = arith.constant 0 : index
    %82 = vector.load %arg5[%c18, %c0_37] : memref<24x128xf32, #tpu.memory_space<vmem>>, vector<6x128xf32>
    tpu.vector_store %arg5[%c18, %c0_37], %81 {strides = array<i32>} : memref<24x128xf32, #tpu.memory_space<vmem>>, vector<6x128xf32>,
    return
  }
  func.func @transform_0(%arg0: i32) -> (i32, i32) {
    %c0_i32 = arith.constant 0 : i32
    %c0_i32_0 = arith.constant 0 : i32
    return %arg0, %c0_i32 : i32, i32
  }
  func.func @transform_1(%arg0: i32) -> (i32, i32) {
    %c0_i32 = arith.constant 0 : i32
    %c0_i32_0 = arith.constant 0 : i32
    return %c0_i32, %arg0 : i32, i32
  }
  func.func @transform_2(%arg0: i32) -> (i32, i32) {
    %c0_i32 = arith.constant 0 : i32
    %c0_i32_0 = arith.constant 0 : i32
    %c0_i32_1 = arith.constant 0 : i32
    return %c0_i32, %c0_i32_0 : i32, i32
  }
  func.func @transform_3(%arg0: i32) -> (i32, i32) {
    %c0_i32 = arith.constant 0 : i32
    %c0_i32_0 = arith.constant 0 : i32
    %c0_i32_1 = arith.constant 0 : i32
    return %c0_i32, %c0_i32_0 : i32, i32
  }
  func.func @transform_4(%arg0: i32) -> (i32, i32) {
    %c0_i32 = arith.constant 0 : i32
    %c0_i32_0 = arith.constant 0 : i32
    return %c0_i32, %arg0 : i32, i32
  }
}

</mosaic_0001>

<bundles_post_ra>
// kernel: hsdne_forward.1
= control target key start
LH: loop header
LB: loop body
LE: loop exit
PB: predicated region body
PF: predicated region fallthrough
CT: control target
= control target key end

     0   :  { %vm62_vm0 = vcmask 130048   ;;  %v1380_v3 = vmov 0   ;;  %vm240_vm2 = vcmask 261120   ;;  %vm1382_vm3 = vmmov 0   ;;  %s1690_s0 = inlined_call_operand.vmem [shape: f32[128,16], index: 0, kind: input, shape index: {}]   ;;  %s1691_s2 = inlined_call_operand.vmem [shape: f32[152,32], index: 2, kind: input, shape index: {}]   ;;  %s1692_s3 = inlined_call_operand.vmem [shape: f32[152,1], index: 3, kind: input, shape index: {}]   ;;  %s1693_s4 = inlined_call_operand.vmem [shape: f32[24,128], index: 4, kind: output, shape index: {}]   ;;  %s1694_s1 = inlined_call_operand.vmem [shape: s32[1,128], index: 1, kind: input, shape index: {}]  }
   0x1   :  { %v18_v0 = vld [vmem:[%s1690_s0] sm:$0xff]  ;;  %v19_v1 = vld [vmem:[%s1690_s0 + $0x8] sm:$0xff]  ;;  %vm1423_vm1 = vmpackc.low %vm62_vm0, %vm62_vm0  ;;  %1330 = vset.pattern.permute.xlu0 %v1380_v3  ;;  %1331 = vset.pattern.permute.xlu1 %v1380_v3  ;;  %vm705_vm4 = vcmask 15360  }
   0x2   :  { %v1238_v4 = vpack.c.bf16 %v19_v1, %v18_v0  ;;  %v20_v5 = vld [vmem:[%s1690_s0 + $0x10] sm:$0xff]  ;;  %v21_v6 = vld [vmem:[%s1690_s0 + $0x18] sm:$0xff]  ;;  %v34_v8 = vld [vmem:[%s1691_s2] sm:$0xff] }
   0x3   :  { %v1244_v7 = vpack.c.bf16 %v21_v6, %v20_v5  ;;  %v22_v9 = vld [vmem:[%s1690_s0 + $0x20] sm:$0xff]  ;;  %v23_v10 = vld [vmem:[%s1690_s0 + $0x28] sm:$0xff]  ;;  %1174 = vmatprep.mubr.msk.f32.mxu0 %vm62_vm0, %v34_v8  ;;  %v40_v12 = vld [vmem:[%s1692_s3 + $0x10] sm:$0xff]  ;;  %v1383_v8 = vmov 0.0  }
   0x4   :  { %1240 = vmatprep.subr.msk.bf16.mxu0 %vm1423_vm1, %v1238_v4  ;;  %v38_v11 = vld [vmem:[%s1692_s3] sm:$0xff]  ;;  %54 = vperm.xlu1 %1331, %v40_v12   ;;  %v1250_v13 = vpack.c.bf16 %v23_v10, %v22_v9  ;;  %v39_v14 = vld [vmem:[%s1692_s3 + $0x8] sm:$0xff]  ;;  %v41_v15 = vld [vmem:[%s1692_s3 + $0x18] sm:$0xff]  ;;  %1040 = vst [vmem:[%s1693_s4 + $0x12] sm:$0x3f] %v1383_v8 }
   0x5   :  { %1243 = vmatpush3.bf16.xpose.msk.msra.mxu0 %vm1423_vm1, %v1238_v4  ;;  %44 = vperm.xlu0 %1330, %v38_v11   ;;  %v216_v16 = vld [vmem:[%s1692_s3 + $0x20] sm:$0xff]  ;;  %v24_v17 = vld [vmem:[%s1690_s0 + $0x30] sm:$0xff]  ;;  %v25_v18 = vld [vmem:[%s1690_s0 + $0x38] sm:$0xff] }
   0x6   :  { %1246 = vmatprep.subr.msk.bf16.mxu0 %vm1423_vm1, %v1244_v7  ;;  %v217_v19 = vld [vmem:[%s1692_s3 + $0x28] sm:$0xff]  ;;  %v1256_v20 = vpack.c.bf16 %v25_v18, %v24_v17  ;;  %v218_v21 = vld [vmem:[%s1692_s3 + $0x30] sm:$0xff]  ;;  %v219_v22 = vld [vmem:[%s1692_s3 + $0x38] sm:$0xff] }
   0x7   :  { %v343_v23 = vld [vmem:[%s1692_s3 + $0x40] sm:$0xff]  ;;  %v27_v25 = vld [vmem:[%s1690_s0 + $0x48] sm:$0xff]  ;;  %v682_v28 = vld [vmem:[%s1692_s3 + $0x50] sm:$0xff] }
   0x8   :  { %59 = vperm.xlu1 %1331, %v41_v15   ;;  %v26_v24 = vld [vmem:[%s1690_s0 + $0x40] sm:$0xff]  ;;  %v681_v26 = vld [vmem:[%s1692_s3 + $0x48] sm:$0xff]  ;;  %v683_v29 = vld [vmem:[%s1692_s3 + $0x58] sm:$0xff] }
   0x9   :  { %49 = vperm.xlu0 %1330, %v39_v14   ;;  %v1262_v27 = vpack.c.bf16 %v27_v25, %v26_v24  ;;  %v684_v30 = vld [vmem:[%s1692_s3 + $0x60] sm:$0xff]  ;;  %v28_v31 = vld [vmem:[%s1690_s0 + $0x50] sm:$0xff]  ;;  %v29_v32 = vld [vmem:[%s1690_s0 + $0x58] sm:$0xff] }
   0xa   :  { %v815_v33 = vld [vmem:[%s1692_s3 + $0x68] sm:$0xff]  ;;  %v1268_v34 = vpack.c.bf16 %v29_v32, %v28_v31  ;;  %v816_v35 = vld [vmem:[%s1692_s3 + $0x70] sm:$0xff]  ;;  %v817_v36 = vld [vmem:[%s1692_s3 + $0x78] sm:$0xff] }
   0xb   :  { %v818_v37 = vld [vmem:[%s1692_s3 + $0x80] sm:$0xff]  ;;  %v31_v39 = vld [vmem:[%s1690_s0 + $0x68] sm:$0xff]  ;;  %v943_v42 = vld [vmem:[%s1692_s3 + $0x90] sm:$0xff] }
   0xc   :  { %227 = vperm.xlu1 %1331, %v217_v19   ;;  %v30_v38 = vld [vmem:[%s1690_s0 + $0x60] sm:$0xff]  ;;  %v942_v40 = vld [vmem:[%s1692_s3 + $0x88] sm:$0xff]  ;;  %v32_v43 = vld [vmem:[%s1690_s0 + $0x70] sm:$0xff] }
   0xd   :  { %1249 = vmatpush3.bf16.xpose.msk.msra.mxu0 %vm1423_vm1, %v1244_v7  ;;  %222 = vperm.xlu0 %1330, %v216_v16   ;;  %v1274_v41 = vpack.c.bf16 %v31_v39, %v30_v38  ;;  %v33_v44 = vld [vmem:[%s1690_s0 + $0x78] sm:$0xff]  ;;  %v35_v46 = vld [vmem:[%s1691_s2 + $0x8] sm:$0xff]  ;;  %v36_v47 = vld [vmem:[%s1691_s2 + $0x10] sm:$0xff]  ;;  %v1381_v7 = vmov 0.0|0.0  }
   0xe   :  { %1252 = vmatprep.subr.msk.bf16.mxu0 %vm1423_vm1, %v1250_v13  ;;  %v1280_v45 = vpack.c.bf16 %v33_v44, %v32_v43  ;;  %v37_v48 = vld [vmem:[%s1691_s2 + $0x18] sm:$0xff]  ;;  %v212_v49 = vld [vmem:[%s1691_s2 + $0x20] sm:$0xff]  ;;  %v213_v4 = vld [vmem:[%s1691_s2 + $0x28] sm:$0xff] }
   0xf   :  { %1188 = vmatprep.mubr.msk.f32.mxu1 %vm240_vm2, %v212_v49  ;;  %v214_v5 = vld [vmem:[%s1691_s2 + $0x30] sm:$0xff]  ;;  %v215_v6 = vld [vmem:[%s1691_s2 + $0x38] sm:$0xff] }
  0x10   :  { %237 = vperm.xlu1 %1331, %v219_v22  }
  0x11   :  { %232 = vperm.xlu0 %1330, %v218_v21  }
  0x14   :  { %687 = vperm.xlu1 %1331, %v681_v26  }
  0x15   :  { %1255 = vmatpush3.bf16.xpose.msk.msra.mxu0 %vm1423_vm1, %v1250_v13  ;;  %346 = vperm.xlu0 %1330, %v343_v23  }
  0x16   :  { %1258 = vmatprep.subr.msk.bf16.mxu0 %vm1423_vm1, %v1256_v20 }
  0x18   :  { %697 = vperm.xlu1 %1331, %v683_v29  }
  0x19   :  { %692 = vperm.xlu0 %1330, %v682_v28   ;;  %v677_v28 = vld [vmem:[%s1691_s2 + $0x48] sm:$0xff] }
  0x1c   :  { %821 = vperm.xlu1 %1331, %v815_v33  }
  0x1d   :  { %1261 = vmatpush3.bf16.xpose.msk.msra.mxu0 %vm1423_vm1, %v1256_v20  ;;  %702 = vperm.xlu0 %1330, %v684_v30  }
  0x1e   :  { %1264 = vmatprep.subr.msk.bf16.mxu0 %vm1423_vm1, %v1262_v27 }
  0x20   :  { %831 = vperm.xlu1 %1331, %v817_v36  }
  0x21   :  { %826 = vperm.xlu0 %1330, %v816_v35  }
  0x24   :  { %946 = vperm.xlu1 %1331, %v942_v40  }
  0x25   :  { %1267 = vmatpush3.bf16.xpose.msk.msra.mxu0 %vm1423_vm1, %v1262_v27  ;;  %836 = vperm.xlu0 %1330, %v818_v37   ;;  %v342_v27 = vld [vmem:[%s1691_s2 + $0x40] sm:$0xff] }
  0x26   :  { %1270 = vmatprep.subr.msk.bf16.mxu0 %vm1423_vm1, %v1268_v34 }
  0x29   :  { %951 = vperm.xlu0 %1330, %v943_v42  }
  0x2d   :  { %1273 = vmatpush3.bf16.xpose.msk.msra.mxu0 %vm1423_vm1, %v1268_v34 }
  0x2e   :  { %1276 = vmatprep.subr.msk.bf16.mxu0 %vm1423_vm1, %v1274_v41 }
  0x35   :  { %1279 = vmatpush3.bf16.xpose.msk.msra.mxu0 %vm1423_vm1, %v1274_v41 }
  0x36   :  { %1282 = vmatprep.subr.msk.bf16.mxu0 %vm1423_vm1, %v1280_v45 }
  0x3d   :  { %1285 = vmatpush3.bf16.xpose.msk.msra.mxu0 %vm1423_vm1, %v1280_v45 }
  0x44   :  { %1175 = vmatmul.mubr.msk.f32.vlgmr.msra.gmra.mrb[0].mxu0 %vm62_vm0, %v35_v46 }
  0x45   :  { %1177 = vmatprep.mubr.msk.f32.mxu0 %vm62_vm0, %v36_v47 }
  0x48   :  { %1178 = vmatmul.mubr.msk.f32.gmra.mrb[2].mxu0 %vm62_vm0, %v37_v48 }
  0x83   :  { %v55_v51 = vpop.permute.xlu1 %54 }
  0x84   :  { %v45_v50 = vpop.permute.xlu0 %44 }
  0x87   :  { %v60_v57 = vpop.permute.xlu1 %59 }
  0x88   :  { %v50_v52 = vpop.permute.xlu0 %49 }
  0x8b   :  { %v228_v9 = vpop.permute.xlu1 %227 }
  0x8c   :  { %v223_v10 = vpop.permute.xlu0 %222 }
  0x8f   :  { %v238_v15 = vpop.permute.xlu1 %237 }
  0x90   :  { %v233_v17 = vpop.permute.xlu0 %232 }
  0x94   :  { %v347_v29 = vpop.permute.xlu0 %346 }
 0x117   :  { %v1176_v53 = vpop.f32.mrb[0].mxu0 }
 0x118   :  { %v195_v54 = vadd.f32 %v1176_v53, %v50_v52  ;;  %v189_v55 = vpop.f32.mrb[1].mxu0  ;;  %v1385_v52 = vmov 2475754826  }
 0x119   :  { %v190_v56 = vadd.f32 %v189_v55, %v45_v50  ;;  %v1384_v50 = vmov 683565275  }
 0x11a   :  { %1332 = vtanh.f32 %v195_v54  ;;  %v1386_v54 = vmov 2131351028  }
 0x11b   :  { %1334 = vtanh.f32 %v190_v56  ;;  %v1179_v58 = vpop.f32.mrb[2].mxu0 }
 0x11c   :  { %v205_v59 = vadd.f32 %v1179_v58, %v60_v57  ;;  %v199_v60 = vpop.f32.mrb[3].mxu0 }
 0x11d   :  { %v200_v61 = vadd.f32 %v199_v60, %v55_v51  ;;  %v1387_v60 = vmov 2102212464  }
 0x11e   :  { %1336 = vtanh.f32 %v205_v59 }
 0x11f   :  { %1338 = vtanh.f32 %v200_v61 }
 0x124   :  { %v1333_v62 = vpop.eup %1332 }
 0x125   :  { %v1335_v63 = vpop.eup %1334 }
 0x126   :  { %v1286_v0 = vpack.c.bf16 %v1333_v62, %v1335_v63  ;;  %v1388_v63 = vmov 920167782  }
 0x128   :  { %v1337_v1 = vpop.eup %1336  ;;  %1287 = vmatprep.subr.bf16.mxu1 %v1286_v0 }
 0x129   :  { %v1339_v2 = vpop.eup %1338  ;;  %1289 = vmatpush3.bf16.msra.mxu1 %v1286_v0 }
 0x12a   :  { %v1290_v3 = vpack.c.bf16 %v1337_v1, %v1339_v2  ;;  %v1389_v2 = vmov 1326507024  }
 0x12c   :  { %1291 = vmatprep.subr.bf16.mxu1 %v1290_v3 }
 0x12d   :  { %1293 = vmatpush3.bf16.msra.mxu1 %v1290_v3 }
 0x12e   :  { %1294 = vmatprep.subr.bf16.mxu1 %v1381_v7 }
 0x130   :  { %1189 = vmatmul.mubr.msk.f32.vlgmr.msra.gmra.mrb[0].mxu1 %vm240_vm2, %v213_v4 }
 0x131   :  { %1191 = vmatprep.mubr.msk.f32.mxu1 %vm240_vm2, %v214_v5 }
 0x134   :  { %1192 = vmatmul.mubr.msk.f32.gmra.mrb[2].mxu1 %vm240_vm2, %v215_v6 }
 0x135   :  { %1202 = vmatprep.mubr.msk.f32.mxu1 %vm1382_vm3, %v1383_v8 }
 0x203   :  { %v1190_v11 = vpop.f32.mrb[0].mxu1 }
 0x204   :  { %v325_v12 = vadd.f32 %v1190_v11, %v228_v9  ;;  %v319_v13 = vpop.f32.mrb[1].mxu1 }
 0x205   :  { %v320_v14 = vadd.f32 %v319_v13, %v223_v10 }
 0x206   :  { %1340 = vtanh.f32 %v325_v12 }
 0x207   :  { %1342 = vtanh.f32 %v320_v14  ;;  %v1193_v16 = vpop.f32.mrb[2].mxu1 }
 0x208   :  { %v335_v18 = vadd.f32 %v1193_v16, %v238_v15  ;;  %v329_v19 = vpop.f32.mrb[3].mxu1 }
 0x209   :  { %v330_v20 = vadd.f32 %v329_v19, %v233_v17 }
 0x20a   :  { %1344 = vtanh.f32 %v335_v18 }
 0x20b   :  { %1346 = vtanh.f32 %v330_v20 }
 0x210   :  { %v1341_v21 = vpop.eup %1340 }
 0x211   :  { %v1343_v22 = vpop.eup %1342 }
 0x212   :  { %v1295_v23 = vpack.c.bf16 %v1341_v21, %v1343_v22 }
 0x214   :  { %v1345_v24 = vpop.eup %1344  ;;  %1296 = vmatpush3.bf16.msra.mxu1 %v1295_v23 }
 0x215   :  { %v1347_v25 = vpop.eup %1346  ;;  %1297 = vmatprep.subr.bf16.mxu1 %v1381_v7 }
 0x216   :  { %v1298_v26 = vpack.c.bf16 %v1345_v24, %v1347_v25 }
 0x218   :  { %1299 = vmatpush3.bf16.msra.mxu1 %v1298_v26 }
 0x21b   :  { %1203 = vmatmul.mubr.msk.f32.vlgmr.msra.gmra.mrb[4].mxu1 %vm240_vm2, %v342_v27 }
 0x21c   :  { %1207 = vmatprep.mubr.msk.f32.mxu1 %vm705_vm4, %v677_v28 }
 0x2ee   :  { %v418_v30 = vpop.f32.mrb[4].mxu1 }
 0x2ef   :  { %v419_v31 = vadd.f32 %v418_v30, %v347_v29  ;;  %v1204_v32 = vpop.f32.mrb[5].mxu1 }
 0x2f1   :  { %1348 = vtanh.f32 %v419_v31  ;;  %v424_v31 = vlaneseq }
 0x2fb   :  { %v1601_v33 = vpop.eup %1348 }
 0x2fc   :  { %v643_v34 = vmul.f32 %v1601_v33, %v1601_v33  ;;  %v1606_v35 = vmul.f32 3.1415927, %v1601_v33 }
 0x2fe   :  { %v645_v36 = vrot.slane %v643_v34, 1  ;;  %v429_v37 = vand.u32 2139095040, %v1606_v35  ;;  %v426_v38 = vand.u32 2147483647, %v1606_v35  ;;  %vm428_vm14 = vcmp.lt.s32.totalorder %v1606_v35, 0 }
 0x300   :  { %v647_v39 = vadd.f32 %v645_v36, %v643_v34  ;;  %v430_v40 = vshrl.u32 %v429_v37, 23  ;;  %v433_v42 = vand.u32 8388607, %v426_v38  ;;  %v1629_v37 = vshrl.u32 %v424_v31, 7  ;;  %v680_v31 = vld [vmem:[%s1691_s2 + $0x60] sm:$0xff] }
 0x301   :  { %vm427_vm15 = vcmp.le.f32.partialorder %v426_v38, 0.7853982 }
 0x302   :  { %v1070_v41 = vadd.s32 4294967169, %v430_v40  ;;  %1350 = vrsqrt.f32 %v647_v39  ;;  %v434_v44 = vor.u32 8388608, %v433_v42  ;;  %vm650_vm6 = vcmp.eq.f32.partialorder %v647_v39, inf }
 0x303   :  { %vm652_vm7 = vcmp.eq.f32.partialorder %v647_v39, 0.0  ;;  %v653_v49 = vand.u32 2147483648, %v647_v39  ;;  %v531_v38 = vsub.s32 0, %v1629_v37 }
 0x304   :  { %v436_v43 = vadd.s32 1, %v1070_v41  ;;  %v474_v56 = vshll.u32 %v434_v44, 8 }
 0x306   :  { %vm437_vm5 = vcmp.gt.s32.totalorder %v436_v43, 0 }
 0x307   :  { %v438_v45 = vsel %vm437_vm5, %v436_v43, 0 }
 0x308   :  { %v440_v46 = vand.u32 31, %v438_v45  ;;  %v439_v47 = vshrl.u32 %v438_v45, 5  ;;  %v663_v45 = vsub.s32 1, %v1629_v37 }
 0x30a   :  { %v441_v48 = vsub.s32 32, %v440_v46  ;;  %v443_v51 = vshll.u32 %v1384_v50, %v440_v46  ;;  %v446_v53 = vshll.u32 %v1385_v52, %v440_v46  ;;  %v449_v55 = vshll.u32 %v1386_v54, %v440_v46 }
 0x30b   :  { %v452_v62 = vshll.u32 %v1387_v60, %v440_v46  ;;  %v455_v1 = vshll.u32 %v1388_v63, %v440_v46  ;;  %vm458_vm8 = vcmp.lt.s32.totalorder %v439_v47, 1  ;;  %vm459_vm9 = vcmp.lt.s32.totalorder %v439_v47, 2 }
 0x30c   :  { %v1351_v57 = vpop.eup %1350  ;;  %v444_v58 = vshrl.u32 %v1385_v52, %v441_v48  ;;  %v447_v59 = vshrl.u32 %v1386_v54, %v441_v48  ;;  %v450_v61 = vshrl.u32 %v1387_v60, %v441_v48  ;;  %v453_v0 = vshrl.u32 %v1388_v63, %v441_v48 }
 0x30d   :  { %v456_v3 = vshrl.u32 %v1389_v2, %v441_v48  ;;  %v649_v7 = vmul.f32 %v1351_v57, %v647_v39  ;;  %vm461_vm10 = vcmp.lt.s32.totalorder %v439_v47, 4  ;;  %v442_v10 = vshrl.u32 %v1384_v50, %v441_v48 }
 0x30e   :  { %v445_v4 = vor.u32 %v444_v58, %v443_v51  ;;  %v448_v5 = vor.u32 %v447_v59, %v446_v53  ;;  %v451_v6 = vor.u32 %v450_v61, %v449_v55  ;;  %v454_v8 = vor.u32 %v453_v0, %v452_v62 }
 0x30f   :  { %v457_v9 = vor.u32 %v456_v3, %v455_v1  ;;  %vm460_vm11 = vcmp.lt.s32.totalorder %v439_v47, 3  ;;  %v651_v16 = vsel %vm650_vm6, %v647_v39, %v649_v7 }
 0x310   :  { %v463_v11 = vsel %vm461_vm10, %v451_v6, 2102212464  ;;  %v466_v12 = vsel %vm458_vm8, %v445_v4, %v448_v5  ;;  %v470_v13 = vsel %vm458_vm8, %v448_v5, %v451_v6  ;;  %v467_v14 = vsel %vm461_vm10, %v454_v8, 920167782 }
 0x311   :  { %v471_v15 = vsel %vm461_vm10, %v457_v9, 1326507024  ;;  %v462_v17 = vsel %vm458_vm8, %v442_v10, %v445_v4  ;;  %v468_v18 = vsel %vm460_vm11, %v451_v6, %v467_v14  ;;  %v654_v20 = vsel %vm652_vm7, %v653_v49, %v651_v16  ;;  %v1078_v9 = vld [vmem:[%s1694_s1] ss:$0 sm:$0xff] }
 0x312   :  { %v472_v19 = vsel %vm460_vm11, %v454_v8, %v471_v15  ;;  %v464_v21 = vsel %vm460_vm11, %v448_v5, %v463_v11  ;;  %v469_v22 = vsel %vm459_vm9, %v466_v12, %v468_v18  ;;  %v655_v24 = vadd.f32 1e-12, %v654_v20 }
 0x313   :  { %v473_v23 = vsel %vm459_vm9, %v470_v13, %v472_v19  ;;  %v1622_v27 = vmul.u32.u64.low %v474_v56, %v469_v22  ;;  %v1623_v28 = vmul.u32.u64.high %v474_v56, %v469_v22, %v1622_v27  ;;  %v465_v29 = vsel %vm459_vm9, %v462_v17, %v464_v21 }
 0x314   :  { %v1619_v25 = vmul.u32.u64.low %v474_v56, %v473_v23  ;;  %v1620_v26 = vmul.u32.u64.high %v474_v56, %v473_v23, %v1619_v25  ;;  %1352 = vrcp.f32 %v655_v24  ;;  %v481_v32 = vmul.u32 %v474_v56, %v465_v29 }
 0x315   :  { %1354 = vtanh.f32 %v654_v20  ;;  %v484_v30 = vadd.s32 1, %v1623_v28  ;;  %vm671_vm0 = vcmp.eq.s32.totalorder %v1078_v9, 1  ;;  %vm518_vm9 = vweird.f32 %v1606_v35 }
 0x316   :  { %vm483_vm12 = vc.u32 %v1620_v26, %v1622_v27  ;;  %v482_v55 = vadd.s32 %v1622_v27, %v1620_v26  ;;  %vm641_vm10 = vcmp.eq.s32.totalorder %v1629_v37, 0  ;;  %vm670_vm11 = vcmp.eq.s32.totalorder %v1078_v9, 0 }
 0x317   :  { %v485_v34 = vsel %vm483_vm12, %v484_v30, %v1623_v28  ;;  %vm718_vm12 = vcmask 1041408   ;;  %v678_v30 = vld [vmem:[%s1691_s2 + $0x50] sm:$0xff] }
 0x318   :  { %v486_v36 = vadd.s32 %v485_v34, %v481_v32  ;;  %v811_v32 = vld [vmem:[%s1691_s2 + $0x68] sm:$0xff]  ;;  %v693_v34 = vpop.permute.xlu0 %692 }
 0x31a   :  { %v487_v39 = vadd.s32 536870912, %v486_v36 }
 0x31c   :  { %v488_v41 = vshrl.u32 %v487_v39, 30 }
 0x31e   :  { %v1353_v40 = vpop.eup %1352  ;;  %v489_v43 = vshll.u32 %v488_v41, 30  ;;  %v512_v3 = vsub.s32 4, %v488_v41 }
 0x31f   :  { %v1355_v42 = vpop.eup %1354 }
 0x320   :  { %v659_v44 = vmul.f32 0.9, %v1355_v42  ;;  %v490_v46 = vsub.s32 %v486_v36, %v489_v43  ;;  %v513_v5 = vsel %vm428_vm14, %v512_v3, %v488_v41  ;;  %v688_v36 = vpop.permute.xlu1 %687  ;;  %v703_v42 = vpop.permute.xlu0 %702 }
 0x321   :  { %v515_v7 = vsel %vm427_vm15, 0, %v513_v5 }
 0x322   :  { %v660_v47 = vmul.f32 %v1353_v40, %v659_v44  ;;  %v492_v48 = vsub.s32 0, %v490_v46  ;;  %v626_v8 = vadd.s32 3, %v515_v7  ;;  %v519_v10 = vand.u32 3, %v515_v7 }
 0x324   :  { %v664_v49 = vrot.slane %v660_v47, %v663_v45  ;;  %v1071_v50 = vmin.u32 %v492_v48, %v490_v46  ;;  %v627_v11 = vand.u32 3, %v626_v8  ;;  %vm524_vm1 = vcmp.eq.s32.totalorder %v519_v10, 2  ;;  %v698_v44 = vpop.permute.xlu1 %697 }
 0x325   :  { %vm521_vm5 = vcmp.eq.s32.totalorder %v519_v10, 0  ;;  %vm520_vm7 = vcmp.lt.s32.totalorder %v519_v10, 2 }
 0x326   :  { %v665_v51 = vmul.f32 %v1601_v33, %v664_v49  ;;  %v494_v52 = vclz %v1071_v50  ;;  %vm632_vm3 = vcmp.eq.s32.totalorder %v627_v11, 2  ;;  %vm629_vm6 = vcmp.eq.s32.totalorder %v627_v11, 0 }
 0x327   :  { %vm628_vm8 = vcmp.lt.s32.totalorder %v627_v11, 2  ;;  %v941_v11 = vld [vmem:[%s1691_s2 + $0x90] sm:$0xff] }
 0x328   :  { %v1072_v53 = vadd.s32 4294967294, %v494_v52  ;;  %v672_v22 = vsel %vm671_vm0, %v665_v51, 0.0 }
 0x329   :  { %v674_v27 = vrot.slane %v672_v22, 1 }
 0x32a   :  { %vm1073_vm13 = vcmp.lt.s32.totalorder %v1072_v53, 0 }
 0x32b   :  { %v497_v54 = vsel %vm1073_vm13, 0, %v1072_v53 }
 0x32c   :  { %v498_v56 = vsub.s32 32, %v497_v54  ;;  %v502_v57 = vsub.s32 4294967266, %v497_v54  ;;  %v499_v58 = vshll.u32 %v490_v46, %v497_v54  ;;  %v812_v54 = vld [vmem:[%s1691_s2 + $0x70] sm:$0xff] }
 0x32e   :  { %v500_v59 = vshrl.u32 %v482_v55, %v498_v56  ;;  %v503_v60 = vadd.s32 127, %v502_v57  ;;  %v813_v55 = vld [vmem:[%s1691_s2 + $0x78] sm:$0xff]  ;;  %v814_v56 = vld [vmem:[%s1691_s2 + $0x80] sm:$0xff]  ;;  %v940_v57 = vld [vmem:[%s1691_s2 + $0x88] sm:$0xff] }
 0x330   :  { %v501_v61 = vor.u32 %v500_v59, %v499_v58  ;;  %v504_v62 = vshll.u32 %v503_v60, 23  ;;  %v827_v58 = vpop.permute.xlu0 %826  ;;  %v822_v59 = vpop.permute.xlu1 %821 }
 0x332   :  { %v505_v63 = vor.u32 4788187, %v504_v62  ;;  %v508_v1 = vcvt.s32.f32 %v501_v61 }
 0x334   :  { %v506_v0 = vand.u32 2147483647, %v505_v63 }
 0x336   :  { %v509_v2 = vmul.f32 %v508_v1, %v506_v0  ;;  %v837_v0 = vpop.permute.xlu0 %836 }
 0x338   :  { %v510_v4 = vxor.u32 2147483648, %v509_v2 }
 0x33a   :  { %v511_v33 = vsel %vm428_vm14, %v510_v4, %v509_v2  ;;  %v832_v2 = vpop.permute.xlu1 %831 }
 0x33b   :  { %v514_v6 = vsel %vm427_vm15, %v1606_v35, %v511_v33  ;;  %v679_v35 = vld [vmem:[%s1691_s2 + $0x58] sm:$0xff] }
 0x33c   :  { %1356 = vcosq.f32 %v514_v6 }
 0x33d   :  { %1358 = vsinq.f32 %v514_v6 }
 0x346   :  { %v1357_v12 = vpop.eup %1356 }
 0x347   :  { %v1359_v13 = vpop.eup %1358  ;;  %v525_v14 = vxor.u32 2147483648, %v1357_v12 }
 0x348   :  { %v522_v15 = vxor.u32 2147483648, %v1359_v13 }
 0x349   :  { %v526_v16 = vsel %vm524_vm1, %v525_v14, %v1359_v13  ;;  %v634_v17 = vsel %vm632_vm3, %v525_v14, %v1359_v13  ;;  %v947_v14 = vpop.permute.xlu1 %946 }
 0x34a   :  { %v523_v18 = vsel %vm521_vm5, %v1357_v12, %v522_v15  ;;  %v631_v19 = vsel %vm629_vm6, %v1357_v12, %v522_v15  ;;  %v952_v12 = vpop.permute.xlu0 %951 }
 0x34b   :  { %v527_v20 = vsel %vm520_vm7, %v523_v18, %v526_v16  ;;  %v635_v21 = vsel %vm628_vm8, %v631_v19, %v634_v17 }
 0x34c   :  { %v528_v23 = vsel %vm518_vm9, nan, %v527_v20  ;;  %v636_v24 = vsel %vm518_vm9, nan, %v635_v21 }
 0x34d   :  { %v532_v25 = vrot.slane %v528_v23, %v531_v38  ;;  %v640_v26 = vrot.slane %v636_v24, %v531_v38 }
 0x34f   :  { %v642_v28 = vsel %vm641_vm10, %v532_v25, %v640_v26 }
 0x350   :  { %v676_v29 = vsel %vm670_vm11, %v642_v28, %v674_v27 }
 0x351   :  { %1205 = vmatprep.subr.msk.mxu1 %vm718_vm12, %v676_v29  ;;  %1039 = vst [vmem:[%s1693_s4 + $0x10] sm:$0x3] %v676_v29 }
 0x352   :  { %1206 = vmatpush3.msk.msra.mxu1 %vm718_vm12, %v676_v29 }
 0x353   :  { %1208 = vmatmul.mubr.msk.f32.vlgmr.msra.gmra.mrb[6].mxu1 %vm705_vm4, %v678_v30 }
 0x354   :  { %1210 = vmatprep.mubr.msk.f32.mxu1 %vm705_vm4, %v679_v35 }
 0x357   :  { %1211 = vmatmul.mubr.msk.f32.gmra.mrb[8].mxu1 %vm705_vm4, %v680_v31 }
 0x358   :  { %1221 = vmatprep.mubr.msk.f32.mxu1 %vm240_vm2, %v811_v32 }
 0x426   :  { %v1209_v37 = vpop.f32.mrb[6].mxu1 }
 0x427   :  { %v794_v39 = vadd.f32 %v1209_v37, %v693_v34  ;;  %v788_v40 = vpop.f32.mrb[7].mxu1 }
 0x428   :  { %v789_v41 = vadd.f32 %v788_v40, %v688_v36 }
 0x429   :  { %1360 = vtanh.f32 %v794_v39 }
 0x42a   :  { %1362 = vtanh.f32 %v789_v41  ;;  %v1212_v43 = vpop.f32.mrb[8].mxu1 }
 0x42b   :  { %v804_v45 = vadd.f32 %v1212_v43, %v703_v42  ;;  %v798_v46 = vpop.f32.mrb[9].mxu1 }
 0x42c   :  { %v799_v47 = vadd.f32 %v798_v46, %v698_v44 }
 0x42d   :  { %1364 = vtanh.f32 %v804_v45 }
 0x42e   :  { %1366 = vtanh.f32 %v799_v47 }
 0x433   :  { %v1361_v48 = vpop.eup %1360 }
 0x434   :  { %v1363_v49 = vpop.eup %1362 }
 0x435   :  { %v1300_v50 = vpack.c.bf16 %v1361_v48, %v1363_v49 }
 0x437   :  { %v1365_v51 = vpop.eup %1364  ;;  %1301 = vmatprep.subr.bf16.mxu1 %v1300_v50 }
 0x438   :  { %v1367_v52 = vpop.eup %1366  ;;  %1303 = vmatpush3.bf16.msra.mxu1 %v1300_v50 }
 0x439   :  { %v1304_v53 = vpack.c.bf16 %v1365_v51, %v1367_v52 }
 0x43b   :  { %1305 = vmatprep.subr.bf16.mxu1 %v1304_v53 }
 0x43c   :  { %1307 = vmatpush3.bf16.msra.mxu1 %v1304_v53 }
 0x43f   :  { %1222 = vmatmul.mubr.msk.f32.vlgmr.msra.gmra.mrb[10].mxu1 %vm240_vm2, %v812_v54 }
 0x440   :  { %1224 = vmatprep.mubr.msk.f32.mxu1 %vm240_vm2, %v813_v55 }
 0x443   :  { %1225 = vmatmul.mubr.msk.f32.gmra.mrb[12].mxu1 %vm240_vm2, %v814_v56 }
 0x444   :  { %1235 = vmatprep.mubr.msk.f32.mxu1 %vm240_vm2, %v940_v57 }
 0x512   :  { %v1223_v60 = vpop.f32.mrb[10].mxu1 }
 0x513   :  { %v923_v61 = vadd.f32 %v1223_v60, %v827_v58  ;;  %v917_v62 = vpop.f32.mrb[11].mxu1 }
 0x514   :  { %v918_v63 = vadd.f32 %v917_v62, %v822_v59 }
 0x515   :  { %1368 = vtanh.f32 %v923_v61 }
 0x516   :  { %1370 = vtanh.f32 %v918_v63  ;;  %v1226_v1 = vpop.f32.mrb[12].mxu1 }
 0x517   :  { %v933_v3 = vadd.f32 %v1226_v1, %v837_v0  ;;  %v927_v4 = vpop.f32.mrb[13].mxu1 }
 0x518   :  { %v928_v33 = vadd.f32 %v927_v4, %v832_v2 }
 0x519   :  { %1372 = vtanh.f32 %v933_v3 }
 0x51a   :  { %1374 = vtanh.f32 %v928_v33 }
 0x51f   :  { %v1369_v5 = vpop.eup %1368 }
 0x520   :  { %v1371_v6 = vpop.eup %1370 }
 0x521   :  { %v1308_v7 = vpack.c.bf16 %v1369_v5, %v1371_v6 }
 0x523   :  { %v1373_v8 = vpop.eup %1372  ;;  %1309 = vmatprep.subr.bf16.mxu1 %v1308_v7 }
 0x524   :  { %v1375_v9 = vpop.eup %1374  ;;  %1311 = vmatpush3.bf16.msra.mxu1 %v1308_v7 }
 0x525   :  { %v1312_v10 = vpack.c.bf16 %v1373_v8, %v1375_v9 }
 0x527   :  { %1313 = vmatprep.subr.bf16.mxu1 %v1312_v10 }
 0x528   :  { %1315 = vmatpush3.bf16.msra.mxu1 %v1312_v10 }
 0x52b   :  { %1236 = vmatmul.mubr.msk.f32.vlgmr.msra.gmra.mrb[14].mxu1 %vm240_vm2, %v941_v11 }
 0x5fe   :  { %v1237_v13 = vpop.f32.mrb[14].mxu1 }
 0x5ff   :  { %v1032_v15 = vadd.f32 %v1237_v13, %v952_v12  ;;  %v1026_v38 = vpop.f32.mrb[15].mxu1 }
 0x600   :  { %v1027_v16 = vadd.f32 %v1026_v38, %v947_v14 }
 0x601   :  { %1376 = vtanh.f32 %v1032_v15 }
 0x602   :  { %1378 = vtanh.f32 %v1027_v16 }
 0x60b   :  { %v1377_v17 = vpop.eup %1376 }
 0x60c   :  { %v1379_v18 = vpop.eup %1378  ;;  %1038 = vst [vmem:[%s1693_s4 + $0x8] sm:$0xff] %v1377_v17 }
 0x60d   :  { %1037 = vst [vmem:[%s1693_s4] sm:$0xff] %v1379_v18 }

</bundles_post_ra>
